<compile_context>
chip_gen: v7x
topology: tpu7x:2x2x1
jax: 0.10.0
libtpu: 0.0.40
codegen_flags: <defaults>
</compile_context>

<pallas_src>
import functools

import jax
import jax.numpy as jnp
from jax.experimental import pallas as pl
from jax.experimental.pallas import tpu as pltpu


def _decoder_kernel(a_ref, nzc_ref, fzc_ref, on_ref, of_ref, *, jn):
    """One grid step (i, j):
       j <  jn : write a (tm, tn_n) tile of node_z @ node_z.T
       j >= jn : write a (tm, tn_f) tile of node_z @ fea_z.T
    Contraction dim D is whole per block -> single MXU dot, no accumulator."""
    j = pl.program_id(1)

    @pl.when(j < jn)
    def _():
        on_ref[...] = jax.lax.dot_general(
            a_ref[...],
            nzc_ref[...],
            dimension_numbers=(((1,), (1,)), ((), ())),   # a @ b.T
            preferred_element_type=jnp.float32,
        ).astype(on_ref.dtype)

    @pl.when(j >= jn)
    def _():
        of_ref[...] = jax.lax.dot_general(
            a_ref[...],
            fzc_ref[...],
            dimension_numbers=(((1,), (1,)), ((), ())),   # a @ b.T
            preferred_element_type=jnp.float32,
        ).astype(of_ref.dtype)


def _decoder_pallas(node_z, fea_z):
    """node_z: [N, D], fea_z: [F, D] -> ([N, N], [N, F]) float32."""
    N, D = node_z.shape
    F_, D2 = fea_z.shape
    assert D == D2

    in_bytes = jnp.dtype(node_z.dtype).itemsize
    out_dtype = jnp.float32
    out_bytes = jnp.dtype(out_dtype).itemsize

    # Generation-aware VMEM budget.
    try:
        vmem_cap = int(pltpu.get_tpu_info().vmem_capacity_bytes)
    except Exception:
        vmem_cap = 64 << 20  # conservative fallback (v7x per-TC)
    limit_cap = max(vmem_cap - (16 << 20), 32 << 20)

    # Tile maxima: 512 on 128 MiB parts (v5e/v6e), 256 on v7x; shrink if the
    # double-buffered whole-D tiles would not fit (very large D).
    t_max = 512 if vmem_cap >= (100 << 20) else 256
    while t_max > 128 and 2 * (3 * t_max * D * in_bytes
                               + 2 * t_max * t_max * out_bytes) > limit_cap:
        t_max //= 2
    # TODO(synk): add K-tiling (grid (i,j,k) + f32 accumulator scratch, k axis
    # "arbitrary") if even 128-wide tiles with whole-D contraction overflow
    # VMEM (D in the several-tens-of-thousands range on v7x).

    tm = N if N <= t_max else t_max          # row tile (second-last dim: full or /8)
    tn_n = N if N <= t_max else t_max        # node-recon column tile
    tn_f = F_ if F_ <= t_max else t_max      # fea-recon column tile

    gi = pl.cdiv(N, tm)
    jn = pl.cdiv(N, tn_n)
    jf = pl.cdiv(F_, tn_f)
    grid = (gi, jn + jf)

    # Double-buffered per-step working set (inputs + both outputs).
    needed = 2 * ((tm + tn_n + tn_f) * D * in_bytes
                  + tm * (tn_n + tn_f) * out_bytes)
    vmem_limit = int(min(max(needed + (4 << 20), 16 << 20), limit_cap))

    cost = pl.CostEstimate(
        flops=2 * N * (N + F_) * D,
        transcendentals=0,
        # A read once (resident across j), column operands re-read per row
        # tile, outputs written once.
        bytes_accessed=(N * D + gi * (N + F_) * D) * in_bytes
                       + N * (N + F_) * out_bytes,
    )

    kernel = functools.partial(_decoder_kernel, jn=jn)

    node_recon, fea_recon = pl.pallas_call(
        kernel,
        out_shape=(
            jax.ShapeDtypeStruct((N, N), out_dtype),
            jax.ShapeDtypeStruct((N, F_), out_dtype),
        ),
        grid=grid,
        in_specs=[
            # node_z as row operand: resident across the whole j sweep.
            pl.BlockSpec((tm, D), lambda i, j: (i, 0)),
            # node_z as column operand (used while j < jn); pinned to its last
            # block during the fea phase so it is not re-fetched.
            pl.BlockSpec((tn_n, D), lambda i, j: (jnp.minimum(j, jn - 1), 0)),
            # fea_z as column operand (used while j >= jn); pinned to block 0
            # during the node phase.
            pl.BlockSpec((tn_f, D), lambda i, j: (jnp.maximum(j - jn, 0), 0)),
        ],
        out_specs=(
            # Written only while j < jn; index pinned afterwards so the block
            # stays resident and is flushed on row change / end of grid.
            pl.BlockSpec((tm, tn_n), lambda i, j: (i, jnp.minimum(j, jn - 1))),
            # Written only while j >= jn; index pinned to column block 0 before.
            pl.BlockSpec((tm, tn_f), lambda i, j: (i, jnp.maximum(j - jn, 0))),
        ),
        compiler_params=pltpu.CompilerParams(
            # Row axis can be sharded across v7x's two TensorCores; the column
            # axis must stay sequential per-core because of the conditional
            # resident-output writes.
            dimension_semantics=("parallel", "arbitrary"),
            vmem_limit_bytes=vmem_limit,
        ),
        cost_estimate=cost,
    )(node_z, node_z, fea_z)

    return node_recon, fea_recon


def decoder_forward(node_z, fea_z):
    """Pallas equivalent of decoder.forward.

    node_z: [N, D], fea_z: [F, D]
    returns (node_recon.flatten(), fea_recon.flatten()) — row-major, matching
    torch's .view([-1]).
    """
    node_z = node_z.astype(jnp.float32)
    fea_z = fea_z.astype(jnp.float32)
    node_recon, fea_recon = _decoder_pallas(node_z, fea_z)
    # Contiguous outputs -> reshape(-1) is free (no slice copies).
    return node_recon.reshape(-1), fea_recon.reshape(-1)


if __name__ == "__main__":
    key = jax.random.PRNGKey(0)
    k1, k2 = jax.random.split(key)

    N, F, D = 8, 16, 32  # small demo shapes: 8 nodes, 16 features, latent 32
    node_z = jax.random.normal(k1, (N, D), dtype=jnp.float32)
    fea_z = jax.random.normal(k2, (F, D), dtype=jnp.float32)

    node_recon, fea_recon = jax.jit(decoder_forward)(node_z, fea_z)
    jax.block_until_ready((node_recon, fea_recon))

    # Reference check against plain JAX.
    ref_node = (node_z @ node_z.T).reshape(-1)
    ref_fea = (node_z @ fea_z.T).reshape(-1)
    assert node_recon.shape == (N * N,)
    assert fea_recon.shape == (N * F,)
    assert jnp.allclose(node_recon, ref_node, atol=1e-5, rtol=1e-5)
    assert jnp.allclose(fea_recon, ref_fea, atol=1e-5, rtol=1e-5)

    print("KERNEL_OK")
</pallas_src>

<mosaic_0001>
module attributes {stable_mosaic.version = 11 : i64} {
  func.func @_decoder_kernel(%arg0: i32, %arg1: i32, %arg2: memref<8x32xf32, #tpu.memory_space<vmem>>, %arg3: memref<8x32xf32, #tpu.memory_space<vmem>>, %arg4: memref<16x32xf32, #tpu.memory_space<vmem>>, %arg5: memref<8x8xf32, #tpu.memory_space<vmem>>, %arg6: memref<8x16xf32, #tpu.memory_space<vmem>>) attributes {dimension_semantics = [#tpu.dimension_semantics<parallel>, #tpu.dimension_semantics<arbitrary>], iteration_bounds = array<i64: 1, 2>, scalar_prefetch = 0 : i64, scratch_operands = 0 : i64, tpu.core_type = #tpu.core_type<tc>, window_params = [{transform_indices = @transform_0, window_bounds = array<i64: 8, 32>}, {transform_indices = @transform_1, window_bounds = array<i64: 8, 32>}, {transform_indices = @transform_2, window_bounds = array<i64: 16, 32>}, {transform_indices = @transform_3, window_bounds = array<i64: 8, 8>}, {transform_indices = @transform_4, window_bounds = array<i64: 8, 16>}]} {
    %c1_i32 = arith.constant 1 : i32
    %0 = arith.cmpi slt, %arg1, %c1_i32 : i32
    %1 = arith.extui %0 : i1 to i32
    %c0_i32 = arith.constant 0 : i32
    %2 = arith.cmpi ne, %1, %c0_i32 : i32
    scf.if %2 {
      %c0 = arith.constant 0 : index
      %c0_2 = arith.constant 0 : index
      %6 = vector.load %arg2[%c0, %c0_2] : memref<8x32xf32, #tpu.memory_space<vmem>>, vector<8x32xf32>
      %c0_3 = arith.constant 0 : index
      %c0_4 = arith.constant 0 : index
      %7 = vector.load %arg3[%c0_3, %c0_4] : memref<8x32xf32, #tpu.memory_space<vmem>>, vector<8x32xf32>
      %cst = arith.constant dense<0.000000e+00> : vector<8x8xf32>
      %8 = tpu.matmul %6, %7, %cst {dimension_numbers = #tpu.dot_dimension_numbers<[1], [1], [0], [0], [0, 0, 1, 0], [], []>} : vector<8x32xf32>, vector<8x32xf32>, vector<8x8xf32> -> vector<8x8xf32>
      %c0_5 = arith.constant 0 : index
      %c0_6 = arith.constant 0 : index
      %9 = vector.load %arg5[%c0_5, %c0_6] : memref<8x8xf32, #tpu.memory_space<vmem>>, vector<8x8xf32>
      tpu.vector_store %arg5[%c0_5, %c0_6], %8 {strides = array<i32>} : memref<8x8xf32, #tpu.memory_space<vmem>>, vector<8x8xf32>,
    } else {
    }
    %c1_i32_0 = arith.constant 1 : i32
    %3 = arith.cmpi sge, %arg1, %c1_i32_0 : i32
    %4 = arith.extui %3 : i1 to i32
    %c0_i32_1 = arith.constant 0 : i32
    %5 = arith.cmpi ne, %4, %c0_i32_1 : i32
    scf.if %5 {
      %c0 = arith.constant 0 : index
      %c0_2 = arith.constant 0 : index
      %6 = vector.load %arg2[%c0, %c0_2] : memref<8x32xf32, #tpu.memory_space<vmem>>, vector<8x32xf32>
      %c0_3 = arith.constant 0 : index
      %c0_4 = arith.constant 0 : index
      %7 = vector.load %arg4[%c0_3, %c0_4] : memref<16x32xf32, #tpu.memory_space<vmem>>, vector<16x32xf32>
      %cst = arith.constant dense<0.000000e+00> : vector<8x16xf32>
      %8 = tpu.matmul %6, %7, %cst {dimension_numbers = #tpu.dot_dimension_numbers<[1], [1], [0], [0], [0, 0, 1, 0], [], []>} : vector<8x32xf32>, vector<16x32xf32>, vector<8x16xf32> -> vector<8x16xf32>
      %c0_5 = arith.constant 0 : index
      %c0_6 = arith.constant 0 : index
      %9 = vector.load %arg6[%c0_5, %c0_6] : memref<8x16xf32, #tpu.memory_space<vmem>>, vector<8x16xf32>
      tpu.vector_store %arg6[%c0_5, %c0_6], %8 {strides = array<i32>} : memref<8x16xf32, #tpu.memory_space<vmem>>, vector<8x16xf32>,
    } else {
    }
    return
  }
  func.func @transform_0(%arg0: i32, %arg1: i32) -> (i32, i32) {
    %c0_i32 = arith.constant 0 : i32
    %c0_i32_0 = arith.constant 0 : i32
    return %arg0, %c0_i32 : i32, i32
  }
  func.func @transform_1(%arg0: i32, %arg1: i32) -> (i32, i32) {
    %c0_i32 = arith.constant 0 : i32
    %0 = arith.minsi %arg1, %c0_i32 : i32
    %c0_i32_0 = arith.constant 0 : i32
    %c0_i32_1 = arith.constant 0 : i32
    return %0, %c0_i32_0 : i32, i32
  }
  func.func @transform_2(%arg0: i32, %arg1: i32) -> (i32, i32) {
    %c1_i32 = arith.constant 1 : i32
    %0 = arith.subi %arg1, %c1_i32 : i32
    %c0_i32 = arith.constant 0 : i32
    %1 = arith.maxsi %0, %c0_i32 : i32
    %c0_i32_0 = arith.constant 0 : i32
    %c0_i32_1 = arith.constant 0 : i32
    return %1, %c0_i32_0 : i32, i32
  }
  func.func @transform_3(%arg0: i32, %arg1: i32) -> (i32, i32) {
    %c0_i32 = arith.constant 0 : i32
    %0 = arith.minsi %arg1, %c0_i32 : i32
    %c0_i32_0 = arith.constant 0 : i32
    return %arg0, %0 : i32, i32
  }
  func.func @transform_4(%arg0: i32, %arg1: i32) -> (i32, i32) {
    %c1_i32 = arith.constant 1 : i32
    %0 = arith.subi %arg1, %c1_i32 : i32
    %c0_i32 = arith.constant 0 : i32
    %1 = arith.maxsi %0, %c0_i32 : i32
    %c0_i32_0 = arith.constant 0 : i32
    return %arg0, %1 : i32, i32
  }
}

</mosaic_0001>

<bundles_post_ra>
// kernel: decoder_forward.1
= control target key start
LH: loop header
LB: loop body
LE: loop exit
PB: predicated region body
PF: predicated region fallthrough
CT: control target
= control target key end

     0   :  { %10 = vsyncpa [#allocation3], 0  ;;  %s1253_s0 = inlined_call_operand.hbm [shape: f32[8,32], index: 0, kind: input, shape index: {}, may-alias: {0,1}]   ;;  %s1254_s1 = inlined_call_operand.hbm [shape: f32[8,32], index: 1, kind: input, shape index: {}, may-alias: {0,1}]   ;;  %s1255_s2 = inlined_call_operand.hbm [shape: f32[16,32], index: 2, kind: input, shape index: {}]   ;;  %s1256_s3 = inlined_call_operand.vmem [shape: f32[8,8], index: 3, kind: output, shape index: {0}]   ;;  %s1257_s4 = inlined_call_operand.vmem [shape: f32[8,16], index: 4, kind: output, shape index: {1}]  }
   0x1   :  { %11 = vsyncpa [#allocation5], 0 }
   0x2   :  { %13 = vsyncpa [#allocation5 + $0x1], 0  ;;  %s1066_s15 = smov 0   ;;  %s1068_s16 = smov 0  }
   0x3   :  { %s1070_s17 = smov 0   ;;  %s1072_s18 = smov 0  }
   0x4   :  { %s1074_s19 = smov 0   ;;  %s1076_s20 = smov 0  }
   0x5   :  { %s1078_s21 = smov 0  }
   0x6 LB: > { %s28_s22 = sadd.s32 1, %s1025_s20  ;;  %p1001_p1 = scmp.ne.s32.totalorder %s1017_s18, 0  ;;  %s1029_s21 = sphi %s1078_s21, %s19_s21   ;;  %s1025_s20 = sphi %s1076_s20, %s1282_s20   ;;  %s1021_s19 = sphi %s1074_s19, %s1281_s19   ;;  %s1017_s18 = sphi %s1072_s18, %s1243_s18   ;;  %s1013_s17 = sphi %s1070_s17, %s1280_s17   ;;  %s1009_s16 = sphi %s1068_s16, %s1238_s16   ;;  %s1005_s15 = sphi %s1066_s15, %s1279_s15  }
   0x7   : > { %p29_p0 = scmp.ge.s32.totalorder %s28_s22, 2  ;;  %p76_p2 = scmp.eq.s32.totalorder %s1029_s21, 0 }
   0x8   : > { %p1002_p4 = scmp.ne.s32.totalorder %s1009_s16, 0  ;;  %p783_p6 = scmp.lt.s32.totalorder %s1029_s21, 2 }
   0x9   : > { %s1284_s22 = smov (%p29_p0, %s28_s22), 0  ;;  %p77_p3 = por %p1001_p1, %p76_p2 }
   0xa   : > { %p109_p5 = por %p1002_p4, %p76_p2  ;;  %s216_s23 = sand.u32 1, %s1029_s21  }
   0xb   : > { %s1031_s24 = smov [#allocation4]   ;;  %p1109_p7 = pnand %p783_p6, %p77_p3 }
   0xc   : > { %s229_s25 = sshll.u32 %s1031_s24, 4  ;;  %p1113_p8 = pnand %p783_p6, %p109_p5  ;;  %s230_s25 = int_to_ptr.vmem [resolvable:$true] %s229_s25 }
   0xd   : > { %s1265_s26 = scalar_select %p1109_p7, 1, 0 }
   0xe   : > { %s1266_s27 = scalar_select %p1113_p8, 1, 0 }
   0xf   : > { %s1117_s28 = scalar_lea.sflag [#allocation5], %s216_s23  ;;  %s865_s5 = scalar_lea.hbm %s1254_s1, 128 }
  0x10   : > { %p866_p9 = scmp.ne.s32.totalorder %s1254_s1, %s865_s5  ;;  %p867_p10 = pneg %p1109_p7 }
  0x11   : > { %p872_p13 = scmp.lt.u32.totalorder %s865_s5, %s865_s5  ;;  %p874_p0 = scmp.lt.u32.totalorder %s865_s5, %s1254_s1 }
  0x12   : > { %p868_p11 = pnand %p867_p10, %p866_p9 }
  0x13   : > { %p875_p1 = por %p874_p0, %p872_p13 }
  0x14   : > { %p869_p12 = pneg %p868_p11 }
  0x16   : > { %p876_p2 = pnand %p875_p1, %p869_p12 }
  0x18   : > { %879 = shalt.err (!%p876_p2)
}
  0x19   : > { %s880_s10 = scalar_lea.vmem %s230_s25, 128  ;;  %s887_s11 = scalar_lea.vmem %s230_s25, 256 }
  0x1a   : > { %p881_p3 = scmp.ne.s32.totalorder %s230_s25, %s880_s10  ;;  %p888_p6 = scmp.lt.s32.totalorder %s230_s25, %s230_s25 }
  0x1b   : > { %p889_p8 = scmp.lt.s32.totalorder %s887_s11, %s880_s10 }
  0x1c   : > { %p883_p4 = pnand %p881_p3, %p867_p10 }
  0x1d   : > { %p890_p7 = por %p889_p8, %p888_p6 }
  0x1e   : > { %p884_p5 = pneg %p883_p4 }
  0x20   : > { %p891_p9 = pnand %p890_p7, %p884_p5 }
  0x22   : > { %894 = shalt.err (!%p891_p9)
}
  0x23   : > { %p1267_p11 = scmp.ne.s32.totalorder %s1265_s26, 0  ;;  %s702_s14 = sadd.s32 4294967295, %s1029_s21  }
  0x24   : > { %p81_p10 = scmp.ne.s32.totalorder %s1017_s18, %s1013_s17  ;;  %p1141_p7 = scmp.eq.s32.totalorder %s702_s14, 0 }
  0x25   : > { %778 = dma.hbm_to_vmem [thread:$0]  (!%p1267_p11), %s1254_s1, 128, %s230_s25, %s1117_s28  }
  0x26   : > { %s1268_s23 = scalar_select %p1141_p7, 1, 0 }
  0x27   : > { %p113_p8 = scmp.ne.s32.totalorder %s1009_s16, %s1005_s15  ;;  %p708_p12 = scmp.ge.s32.totalorder %s1029_s21, 1 }
  0x28   : > { %p1150_p13 = por %p1141_p7, %p81_p10  ;;  %p190_p0 = scmp.lt.s32.totalorder %s1029_s21, 3 }
  0x29   : > { %p1157_p1 = por %p113_p8, %p1141_p7  ;;  %s1032_s26 = smov [#allocation2]  }
  0x2a   : > { %s1269_s24 = scalar_select %p1150_p13, 1, 0 }
  0x2b   : > { %s1270_s25 = scalar_select %p1157_p1, 1, 0 }
  0x2c   : > { %p1161_p2 = pnand %p708_p12, %p190_p0  ;;  %s205_s29 = sshll.u32 %s1032_s26, 4  ;;  %s206_s29 = int_to_ptr.vmem [resolvable:$true] %s205_s29 }
  0x2d   : > { %s895_s6 = scalar_lea.hbm %s1253_s0, 128 }
  0x2e   : > { %s1271_s17 = scalar_select %p1161_p2, 1, 0 }
  0x2f   : > { %p771_p3 = pneg %p1161_p2  ;;  %p896_p5 = scmp.ne.s32.totalorder %s1253_s0, %s895_s6 }
  0x30   : > { %p902_p10 = scmp.lt.u32.totalorder %s895_s6, %s1253_s0 }
  0x31   : > { %p1169_p4 = pnand %p771_p3, %p1141_p7 }
  0x33   : > { %p897_p6 = pneg %p1169_p4 }
  0x35   : > { %p898_p9 = pnand %p897_p6, %p896_p5 }
  0x37   : > { %p899_p11 = pneg %p898_p9 }
  0x39   : > { %p904_p8 = pnand %p902_p10, %p899_p11 }
  0x3b   : > { %907 = shalt.err (!%p904_p8)
}
  0x3c   : > { %s908_s11 = scalar_lea.vmem %s206_s29, 128  ;;  %p916_p1 = scmp.lt.s32.totalorder %s206_s29, %s206_s29 }
  0x3d   : > { %p909_p12 = scmp.ne.s32.totalorder %s206_s29, %s908_s11  ;;  %p917_p13 = scmp.lt.s32.totalorder %s908_s11, %s908_s11 }
  0x3f   : > { %p911_p0 = pnand %p909_p12, %p897_p6  ;;  %p918_p7 = por %p917_p13, %p916_p1 }
  0x41   : > { %p912_p3 = pneg %p911_p0 }
  0x43   : > { %p919_p2 = pnand %p918_p7, %p912_p3 }
  0x45   : > { %922 = shalt.err (!%p919_p2)
}
  0x46   : > { %774 = dma.hbm_to_vmem [thread:$0]  (!%p1169_p4), %s1253_s0, 128, %s206_s29, [#allocation3]  }
  0x47   : > { %s1033_s26 = smov [#allocation6]   ;;  %s923_s7 = scalar_lea.hbm %s1255_s2, 256 }
  0x48   : > { %s250_s30 = sshll.u32 %s1033_s26, 4  ;;  %p924_p13 = scmp.ne.s32.totalorder %s1255_s2, %s923_s7  ;;  %s251_s30 = int_to_ptr.vmem [resolvable:$true] %s250_s30 }
  0x49   : > { %p1273_p7 = scmp.ne.s32.totalorder %s1266_s27, 0  ;;  %p930_p6 = scmp.lt.u32.totalorder %s923_s7, %s923_s7 }
  0x4a   : > { %p932_p4 = scmp.lt.u32.totalorder %s923_s7, %s1255_s2 }
  0x4b   : > { %p925_p1 = pneg %p1273_p7 }
  0x4c   : > { %p933_p9 = por %p932_p4, %p930_p6 }
  0x4d   : > { %p926_p2 = pnand %p925_p1, %p924_p13 }
  0x4f   : > { %p927_p5 = pneg %p926_p2 }
  0x51   : > { %p934_p11 = pnand %p933_p9, %p927_p5 }
  0x53   : > { %937 = shalt.err (!%p934_p11)
}
  0x54   : > { %s938_s29 = scalar_lea.vmem %s251_s30, 256  ;;  %s945_s11 = scalar_lea.vmem %s251_s30, 512 }
  0x55   : > { %p939_p10 = scmp.ne.s32.totalorder %s251_s30, %s938_s29  ;;  %p946_p0 = scmp.lt.s32.totalorder %s251_s30, %s251_s30 }
  0x56   : > { %p947_p3 = scmp.lt.s32.totalorder %s945_s11, %s938_s29 }
  0x57   : > { %p941_p8 = pnand %p939_p10, %p925_p1 }
  0x58   : > { %p948_p7 = por %p947_p3, %p946_p0 }
  0x59   : > { %p942_p12 = pneg %p941_p8 }
  0x5b   : > { %p949_p13 = pnand %p948_p7, %p942_p12 }
  0x5d   : > { %952 = shalt.err (!%p949_p13)
}
  0x5e   : > { %s1034_s12 = smov 128   ;;  %s1035_s13 = smov 8  }
  0x5f   : > { %p1274_p2 = scmp.ne.s32.totalorder %s1266_s27, 0  ;;  %p1275_p5 = scmp.ne.s32.totalorder %s1271_s17, 0 }
  0x60   : > { %p1276_p1 = scmp.ne.s32.totalorder (!%p1275_p5), %s1268_s23, 0 }
  0x61   : > { %781 = dma.hbm_to_vmem [thread:$0]  (!%p1274_p2), %s1255_s2, 256, %s251_s30, %s1117_s28, %s1034_s12, %s1034_s12, %s1035_s13  }
  0x62   : > { %262 = sbr.rel (%p1275_p5) target bundleno = 559 (0x22f), region = 32 }
  0x69   : > { %990 = dma.done.wait (%p1276_p1), [#allocation3], 128  }
  0x6a   : > { %992 = vsyncadd (%p1276_p1), [#allocation3], 4294967168  ;;  %s268_s6 = sand.u32 1, %s702_s14   ;;  %s270_s7 = sand.u32 1, %s1017_s18  }
  0x6b   : > { %s719_s27 = sshll.u32 %s270_s7, 3  ;;  %s269_s8 = scalar_lea.sflag [#allocation5], %s268_s6 }
  0x6c   : > { %s272_s9 = scalar_lea.vmem [#allocation4], %s719_s27  ;;  %p1277_p7 = scmp.ne.s32.totalorder %s1269_s24, 0 }
  0x6e   : > { %994 = dma.done.wait (%p1277_p7), %s269_s8, 128  }
  0x6f   : > { %996 = vsyncadd (%p1277_p7), %s269_s8, 4294967168  ;;  %s279_s28 = sand.u32 1, %s1009_s16   ;;  %p1278_p6 = scmp.ne.s32.totalorder %s1270_s25, 0 }
  0x70   : > { %s720_s17 = sshll.u32 %s279_s28, 4 }
  0x71   : > { %s281_s23 = scalar_lea.vmem [#allocation6], %s720_s17 }
  0x72   : > { %998 = dma.done.wait (%p1278_p6), %s269_s8, 256  }
  0x73   : > { %1000 = vsyncadd (%p1278_p6), %s269_s8, 4294967040  ;;  %p331_p4 = scmp.lt.s32.totalorder %s1021_s19, 0  ;;  %p732_p9 = scmp.ge.s32.totalorder %s1021_s19, 1 }
  0x74   : > { %v360_v0 = vld [vmem:[%s272_s9] sm:$0xff] (!%p732_p9)  ;;  %vm361_vm0 = vcmask (!%p732_p9), 261120   ;;  %v1036_v1 = vmov (!%p732_p9), 0.0   ;;  %vm1037_vm1 = vmmov (!%p732_p9), 0   ;;  %v359_v2 = vld [vmem:[#allocation2] sm:$0xff] (!%p732_p9)  ;;  %vm438_vm2 = vcmask (!%p732_p9), 64512  }
  0x75   : > { %s332_s14 = scalar_select %p331_p4, %s1021_s19, 0 }
  0x76   : > { %358 = sbr.rel (%p732_p9) target bundleno = 335 (0x14f), region = 48  ;;  %747 = vmatprep.subr.mxu0 (!%p732_p9), %v1036_v1  ;;  %749 = vmatprep.mubr.msk.f32.mxu0 (!%p732_p9), %vm1037_vm1, %v1036_v1 }
  0x77   : > { %s1286_s14 = smov (!%p331_p4, %s332_s14), 0  ;;  %748 = vmatpush3.xpose.msk.msra.mxu0 (!%p732_p9), %vm361_vm0, %v360_v0 }
  0x78   : > { %s724_s30 = sshll.u32 %s1286_s14, 3 }
  0x79   : > { %s339_s24 = scalar_lea.vmem %s1256_s3, %s724_s30 }
  0x7a   : > { %750 = vmatmul.mubr.msk.f32.vlgmr.msra.gmra.mrb[0].mxu0 (!%p732_p9), %vm361_vm0, %v359_v2 }
 0x14d   : > { %v434_v3 = vpop.f32.mrb[0].mxu0 }
 0x14e   : > { %439 = vst.msk [vmem:[%s339_s24] sm:$0xff] %vm438_vm2, %v434_v3  ;;  %v751_v4 = vpop.f32.mrb[1].mxu0 }
 0x14f PF: > { %p735_p11 = scmp.lt.s32.totalorder %s1021_s19, 1 }
 0x150   : > { %v445_v5 = vld [vmem:[%s281_s23] sm:$0xff] (!%p735_p11)  ;;  %v446_v6 = vld [vmem:[%s281_s23 + $0x8] sm:$0xff] (!%p735_p11)  ;;  %vm447_vm3 = vcmask (!%p735_p11), 261120   ;;  %v1038_v7 = vmov (!%p735_p11), 0.0|0.0   ;;  %vm1039_vm5 = vmmov (!%p735_p11), 0   ;;  %v1040_v9 = vmov (!%p735_p11), 0.0  }
 0x151   : > { %443 = sbr.rel (%p735_p11) target bundleno = 559 (0x22f), region = 52  ;;  %759 = vmatprep.subr.bf16.mxu0 (!%p735_p11), %v1038_v7  ;;  %v760_v8 = vpack.c.bf16 (!%p735_p11), %v446_v6, %v445_v5  ;;  %vm761_vm4 = vmpackc.low (!%p735_p11), %vm447_vm3, %vm447_vm3  ;;  %756 = vmatprep.mubr.msk.f32.mxu0 (!%p735_p11), %vm1039_vm5, %v1040_v9  ;;  %v444_v10 = vld [vmem:[#allocation2] sm:$0xff] (!%p735_p11)  ;;  %vm527_vm6 = vcmask (!%p735_p11), 130048  }
 0x153   : > { %762 = vmatpush3.bf16.xpose.msk.msra.mxu0 (!%p735_p11), %vm761_vm4, %v760_v8 }
 0x15a   : > { %757 = vmatmul.mubr.msk.f32.vlgmr.msra.gmra.mrb[0].mxu0 %vm447_vm3, %v444_v10 }
 0x22d   : > { %v523_v11 = vpop.f32.mrb[0].mxu0 }
 0x22e   : > { %528 = vst.msk [vmem:[%s1257_s4] sm:$0xff] %vm527_vm6, %v523_v11  ;;  %v758_v12 = vpop.f32.mrb[1].mxu0 }
 0x22f PF: > { %s19_s21 = sadd.s32 1, %s1029_s21   ;;  %s1279_s15 = smov %s1009_s16 }
 0x230   : > { %p16_p10 = scmp.ge.s32.totalorder %s19_s21, 4   ;;  %s1238_s16 = smov 0  }
 0x231   : > { %s1280_s17 = smov %s1017_s18  ;;  %s1243_s18 = smov 0  }
 0x232   : > { %s1281_s19 = smov %s1025_s20  ;;  %s1282_s20 = smov %s1284_s22 }
 0x233   :  { %18 = sbr.rel (!%p16_p10) target bundleno = 6 (0x6), region = 109 }
 0x23a   :  { %589 = vsyncpa [#allocation3], 1 }
 0x23b   :  { %591 = vsyncpa [#allocation3 + $0x1], 1 }
 0x23c   :  { %592 = vsyncpa [#allocation5], 1 }
 0x23d   :  { %594 = vsyncpa [#allocation5 + $0x1], 1 }

</bundles_post_ra>
